<compile_context>
chip_gen: v7x
topology: tpu7x:2x2x1
jax: 0.10.0
libtpu: 0.0.40
codegen_flags: <defaults>
</compile_context>

<pallas_src>
import functools

import jax
import jax.numpy as jnp
from jax.experimental import pallas as pl
from jax.experimental.pallas import tpu as pltpu

LANE = 128          # TPU lane width: channel-like dims padded lane-dense
SUBLANES_BF16 = 16  # bf16 packs 16 sublanes per vreg; pad node rows to this


def _round_up(v, m):
    return (v + m - 1) // m * m


# --------------------------------------------------------------------------- #
# Kernel: one grid program = one graph (one population candidate).             #
# --------------------------------------------------------------------------- #
def graph_nca_kernel(x_ref, a_ref, wf_ref, b1_ref, w2_ref, b2_ref, out_ref,
                     *, num_steps, unroll):
    """T fused GraphNCA steps.  One step == the PyTorch module's forward():

         feat = GCNConv(x)            = A_hat @ (x @ Wp^T)
         h    = relu(feat @ W1^T + b1)
         x    = x + h @ W2^T + b2

       With Wf := Wp^T @ W1^T fused host-side this collapses to
         h = relu((A_hat @ x) @ Wf + b1);   x += h @ W2^T + b2
    """
    n_rows = x_ref.shape[0]

    a = a_ref[...]                      # (n_p, n_p) f32 — kept f32 (normalization precision)
    wf = wf_ref[...]                    # (c_p, h_p) bf16 — fused Wp^T @ W1^T
    w2 = w2_ref[...]                    # (h_p, c_p) bf16
    # Hoist bias broadcasts out of the step loop (JAX does not CSE broadcast_in_dim).
    b1 = jnp.broadcast_to(b1_ref[...], (n_rows, b1_ref.shape[1]))   # (n_p, h_p) f32
    b2 = jnp.broadcast_to(b2_ref[...], (n_rows, b2_ref.shape[1]))   # (n_p, c_p) f32

    def step(_, x):
        # f32 aggregation: A_hat kept f32 so degree-normalization error does not
        # compound through the residual update over long rollouts.
        ag = jnp.dot(a, x, preferred_element_type=jnp.float32)          # (n_p, c_p)
        # Fused perception + first MLP layer: one bf16 MXU matmul, f32 accumulate.
        h = jnp.dot(ag.astype(jnp.bfloat16), wf,
                    preferred_element_type=jnp.float32) + b1            # (n_p, h_p)
        h = jnp.maximum(h, 0.0)
        upd = jnp.dot(h.astype(jnp.bfloat16), w2,
                      preferred_element_type=jnp.float32)               # (n_p, c_p)
        return x + upd + b2          # residual update; b2 folded into the final add

    out_ref[...] = jax.lax.fori_loop(0, num_steps, step, x_ref[...],
                                     unroll=unroll)


# --------------------------------------------------------------------------- #
# One-time parameter preparation (padding, bf16 cast, Wp*W1 fusion).           #
# --------------------------------------------------------------------------- #
def prepare_graph_nca_params(wp_t, w1_t, b1, w2_t, b2):
    """Fuse Wp*W1, pad to lane-dense shapes, cast weights to bf16 — done once,
    outside the per-call path.  Padded weight rows/cols and padded bias lanes
    are zero, which keeps padded channels of the state identically zero across
    all NCA steps."""
    c, three_c = wp_t.shape
    hidden = w1_t.shape[1]
    assert w1_t.shape[0] == three_c and w2_t.shape == (hidden, c)
    assert b1.shape == (1, hidden) and b2.shape == (1, c)

    c_p = _round_up(c, LANE)
    h_p = _round_up(hidden, LANE)

    # Exact (f32) algebraic fusion of GCN projection and first MLP layer.
    wf = jnp.dot(wp_t, w1_t, preferred_element_type=jnp.float32)        # (C, H)

    wf_p = jnp.zeros((c_p, h_p), jnp.float32).at[:c, :hidden].set(wf).astype(jnp.bfloat16)
    w2_p = jnp.zeros((h_p, c_p), jnp.float32).at[:hidden, :c].set(w2_t).astype(jnp.bfloat16)
    b1_p = jnp.zeros((1, h_p), jnp.float32).at[:, :hidden].set(b1)
    b2_p = jnp.zeros((1, c_p), jnp.float32).at[:, :c].set(b2)

    # Zero-invariance of the padded channels depends on padded bias lanes = 0.
    assert float(jnp.sum(jnp.abs(b1_p[:, hidden:]))) == 0.0
    assert float(jnp.sum(jnp.abs(b2_p[:, c:]))) == 0.0

    return {"wf": wf_p, "w2": w2_p, "b1": b1_p, "b2": b2_p,
            "c": c, "c_p": c_p, "h_p": h_p}


# --------------------------------------------------------------------------- #
# Forward wrapper: batched (B, N, C) or single (N, C).                         #
# --------------------------------------------------------------------------- #
def graph_nca_forward(x, a_hat, params, *, num_steps=1):
    """Run `num_steps` fused GraphNCA steps in a single pallas_call.

    x      : (N, C) or (B, N, C)   node states (f32); B = population / batch
    a_hat  : (N, N) or (B, N, N)   dense normalized adjacency (f32)
    params : dict from prepare_graph_nca_params
    """
    squeeze = x.ndim == 2
    if squeeze:
        x = x[None]
    batch, n, c = x.shape
    assert c == params["c"]
    if a_hat.ndim == 2:
        a_hat = jnp.broadcast_to(a_hat[None], (batch, n, n))

    n_p = _round_up(n, SUBLANES_BF16)
    c_p, h_p = params["c_p"], params["h_p"]

    # Per-call padding of state / adjacency only (weights were prepared once).
    x_p = jnp.zeros((batch, n_p, c_p), jnp.float32).at[:, :n, :c].set(x)
    a_p = jnp.zeros((batch, n_p, n_p), jnp.float32).at[:, :n, :n].set(a_hat)

    kernel = functools.partial(graph_nca_kernel, num_steps=num_steps,
                               unroll=min(int(num_steps), 4))

    # TODO(synk): for large N, tile the dense aggregation with a grid — node-row
    # axis "parallel", node-column (K) reduction axis last + "arbitrary" with an
    # f32 VMEM accumulator, K padded to 128/256 so the MXU contraction depth is
    # filled, and A streamed as bf16 row-tiles sized against v7x's 64 MiB VMEM
    # (set vmem_limit_bytes) rather than v5e/v6e's 128 MiB.
    out_p = pl.pallas_call(
        kernel,
        out_shape=jax.ShapeDtypeStruct((batch, n_p, c_p), jnp.float32),
        grid=(batch,),
        in_specs=[
            pl.BlockSpec((pl.Squeezed(), n_p, c_p), lambda i: (i, 0, 0)),  # x state (f32)
            pl.BlockSpec((pl.Squeezed(), n_p, n_p), lambda i: (i, 0, 0)),  # A_hat   (f32)
            pl.BlockSpec((c_p, h_p), lambda i: (0, 0)),                    # Wf      (bf16)
            pl.BlockSpec((1, h_p), lambda i: (0, 0)),                      # b1      (f32)
            pl.BlockSpec((h_p, c_p), lambda i: (0, 0)),                    # W2^T    (bf16)
            pl.BlockSpec((1, c_p), lambda i: (0, 0)),                      # b2      (f32)
        ],
        out_specs=pl.BlockSpec((pl.Squeezed(), n_p, c_p), lambda i: (i, 0, 0)),
        input_output_aliases={0: 0},     # residual state update is in-place
        compiler_params=pltpu.CompilerParams(
            dimension_semantics=("parallel",)),   # shard population across TCs (v7x)
    )(x_p, a_p, params["wf"], params["b1"], params["w2"], params["b2"])

    out = out_p[:, :n, :c]
    return out[0] if squeeze else out


# --------------------------------------------------------------------------- #
# Plain-JAX glue: adjacency, params, reference.                                #
# --------------------------------------------------------------------------- #
def gcn_normalized_adjacency(edge_index, num_nodes):
    """Dense A_hat = D^{-1/2} (A + I) D^{-1/2}, matching PyG GCNConv defaults
    (add_self_loops=True, symmetric normalization)."""
    src, dst = edge_index[0], edge_index[1]
    a = jnp.zeros((num_nodes, num_nodes), jnp.float32)
    a = a.at[dst, src].add(1.0)                      # message src -> dst
    a = a + jnp.eye(num_nodes, dtype=jnp.float32)    # self loops
    deg = a.sum(axis=1)
    dinv = jax.lax.rsqrt(jnp.maximum(deg, 1e-12))
    return dinv[:, None] * a * dinv[None, :]


def init_params(key, num_channels=16, hidden=32):
    c, h = num_channels, hidden
    k = jax.random.split(key, 5)
    # GCNConv weight: Linear(C, 3C, bias=False); stored transposed as (C, 3C)
    wp_t = jax.random.normal(k[0], (c, 3 * c), jnp.float32) * (1.0 / jnp.sqrt(c))
    # update_net: Linear(3C, 32) -> ReLU -> Linear(32, C); stored transposed
    w1_t = jax.random.normal(k[1], (3 * c, h), jnp.float32) * (1.0 / jnp.sqrt(3 * c))
    b1 = jax.random.normal(k[2], (1, h), jnp.float32) * 0.01
    w2_t = jax.random.normal(k[3], (h, c), jnp.float32) * (1.0 / jnp.sqrt(h))
    b2 = jax.random.normal(k[4], (1, c), jnp.float32) * 0.01
    return wp_t, w1_t, b1, w2_t, b2


def reference_rollout(x, a_hat, wp_t, w1_t, b1, w2_t, b2, num_steps):
    """Pure-JAX reference mirroring the kernel's numerics: fused Wp*W1 weight in
    bf16, f32 A_hat aggregation, f32 accumulation, bf16 weight-matmul operands."""
    wf = jnp.dot(wp_t, w1_t).astype(jnp.bfloat16)
    w2 = w2_t.astype(jnp.bfloat16)
    for _ in range(num_steps):
        ag = jnp.dot(a_hat, x, preferred_element_type=jnp.float32)
        h = jnp.maximum(jnp.dot(ag.astype(jnp.bfloat16), wf,
                                preferred_element_type=jnp.float32) + b1, 0.0)
        upd = jnp.dot(h.astype(jnp.bfloat16), w2,
                      preferred_element_type=jnp.float32) + b2
        x = x + upd
    return x


if __name__ == "__main__":
    num_nodes = 8
    num_channels = 16
    num_steps = 4
    batch = 2              # small "population" of graph states / candidates

    key = jax.random.PRNGKey(0)
    k_x, k_p = jax.random.split(key)

    # Batched node features (B, N, C): two different states on the same graph.
    x = jax.random.normal(k_x, (batch, num_nodes, num_channels), jnp.float32)

    # Undirected ring graph on 8 nodes (both directions listed)
    src = jnp.array([0, 1, 2, 3, 4, 5, 6, 7, 1, 2, 3, 4, 5, 6, 7, 0], jnp.int32)
    dst = jnp.array([1, 2, 3, 4, 5, 6, 7, 0, 0, 1, 2, 3, 4, 5, 6, 7], jnp.int32)
    edge_index = jnp.stack([src, dst])

    a_hat = gcn_normalized_adjacency(edge_index, num_nodes)
    wp_t, w1_t, b1, w2_t, b2 = init_params(k_p, num_channels)
    params = prepare_graph_nca_params(wp_t, w1_t, b1, w2_t, b2)

    # One step == the PyTorch module's forward(); T steps == fused NCA rollout.
    out1 = graph_nca_forward(x, a_hat, params, num_steps=1)
    outT = graph_nca_forward(x, a_hat, params, num_steps=num_steps)
    out1, outT = jax.block_until_ready((out1, outT))

    for bidx in range(batch):
        # Check against a pure-JAX reference mirroring the kernel's dtype policy.
        ref1 = reference_rollout(x[bidx], a_hat, wp_t, w1_t, b1, w2_t, b2, 1)
        refT = reference_rollout(x[bidx], a_hat, wp_t, w1_t, b1, w2_t, b2, num_steps)
        assert jnp.allclose(out1[bidx], ref1, atol=1e-2, rtol=1e-2)
        assert jnp.allclose(outT[bidx], refT, atol=1e-2, rtol=1e-2)

        # Sanity check of a single step against the original full-f32, non-fused
        # module semantics (GCNConv -> Linear/ReLU -> Linear, residual add).
        feat_f32 = a_hat @ (x[bidx] @ wp_t)
        h_f32 = jnp.maximum(feat_f32 @ w1_t + b1, 0.0)
        ref_f32 = x[bidx] + (h_f32 @ w2_t + b2)
        assert jnp.allclose(out1[bidx], ref_f32, atol=5e-2, rtol=5e-2)

    # Unbatched (N, C) path, as used by forward()/grow() on a single graph.
    out_single = jax.block_until_ready(
        graph_nca_forward(x[0], a_hat, params, num_steps=1))
    assert jnp.allclose(out_single, out1[0], atol=1e-5, rtol=1e-5)

    # TODO(synk): split_network / grow(), CSV-driven distance-matrix loss and
    # CMA-ES optimization are host-side / graph-mutation logic, not part of
    # forward(); not kernelized.
    print("KERNEL_OK")
</pallas_src>

<mosaic_0001>
module attributes {stable_mosaic.version = 11 : i64} {
  func.func @graph_nca_kernel(%arg0: i32, %arg1: memref<1x16x128xf32, #tpu.memory_space<vmem>>, %arg2: memref<1x16x16xf32, #tpu.memory_space<vmem>>, %arg3: memref<128x128xbf16, #tpu.memory_space<vmem>>, %arg4: memref<1x128xf32, #tpu.memory_space<vmem>>, %arg5: memref<128x128xbf16, #tpu.memory_space<vmem>>, %arg6: memref<1x128xf32, #tpu.memory_space<vmem>>, %arg7: memref<1x16x128xf32, #tpu.memory_space<vmem>>) attributes {dimension_semantics = [#tpu.dimension_semantics<parallel>], iteration_bounds = array<i64: 2>, scalar_prefetch = 0 : i64, scratch_operands = 0 : i64, tpu.core_type = #tpu.core_type<tc>, window_params = [{transform_indices = @transform_0, window_bounds = array<i64: 1, 16, 128>}, {transform_indices = @transform_1, window_bounds = array<i64: 1, 16, 16>}, {pipeline_mode = #tpu.pipeline_mode<synchronous>, transform_indices = @transform_2, window_bounds = array<i64: 128, 128>}, {pipeline_mode = #tpu.pipeline_mode<synchronous>, transform_indices = @transform_3, window_bounds = array<i64: 1, 128>}, {pipeline_mode = #tpu.pipeline_mode<synchronous>, transform_indices = @transform_4, window_bounds = array<i64: 128, 128>}, {pipeline_mode = #tpu.pipeline_mode<synchronous>, transform_indices = @transform_5, window_bounds = array<i64: 1, 128>}, {transform_indices = @transform_6, window_bounds = array<i64: 1, 16, 128>}]} {
    %c0 = arith.constant 0 : index
    %c0_0 = arith.constant 0 : index
    %c0_1 = arith.constant 0 : index
    %0 = vector.load %arg2[%c0, %c0_0, %c0_1] : memref<1x16x16xf32, #tpu.memory_space<vmem>>, vector<1x16x16xf32>
    %1 = vector.shape_cast %0 : vector<1x16x16xf32> to vector<16x16xf32>
    %c0_2 = arith.constant 0 : index
    %c0_3 = arith.constant 0 : index
    %2 = vector.load %arg3[%c0_2, %c0_3] : memref<128x128xbf16, #tpu.memory_space<vmem>>, vector<128x128xbf16>
    %c0_4 = arith.constant 0 : index
    %c0_5 = arith.constant 0 : index
    %3 = vector.load %arg5[%c0_4, %c0_5] : memref<128x128xbf16, #tpu.memory_space<vmem>>, vector<128x128xbf16>
    %c0_6 = arith.constant 0 : index
    %c0_7 = arith.constant 0 : index
    %4 = vector.load %arg4[%c0_6, %c0_7] : memref<1x128xf32, #tpu.memory_space<vmem>>, vector<1x128xf32>
    %5 = vector.shape_cast %4 : vector<1x128xf32> to vector<1x128xf32>
    %6 = vector.broadcast %5 : vector<1x128xf32> to vector<16x128xf32>
    %c0_8 = arith.constant 0 : index
    %c0_9 = arith.constant 0 : index
    %7 = vector.load %arg6[%c0_8, %c0_9] : memref<1x128xf32, #tpu.memory_space<vmem>>, vector<1x128xf32>
    %8 = vector.shape_cast %7 : vector<1x128xf32> to vector<1x128xf32>
    %9 = vector.broadcast %8 : vector<1x128xf32> to vector<16x128xf32>
    %c0_10 = arith.constant 0 : index
    %c0_11 = arith.constant 0 : index
    %c0_12 = arith.constant 0 : index
    %10 = vector.load %arg1[%c0_10, %c0_11, %c0_12] : memref<1x16x128xf32, #tpu.memory_space<vmem>>, vector<1x16x128xf32>
    %11 = vector.shape_cast %10 : vector<1x16x128xf32> to vector<16x128xf32>
    %c0_i32 = arith.constant 0 : i32
    %cst = arith.constant dense<0.000000e+00> : vector<16x128xf32>
    %12 = tpu.matmul %1, %11, %cst {dimension_numbers = #tpu.dot_dimension_numbers<[1], [0], [0], [1], [0, 0, 1, 1], [], []>} : vector<16x16xf32>, vector<16x128xf32>, vector<16x128xf32> -> vector<16x128xf32>
    %13 = arith.truncf %12 : vector<16x128xf32> to vector<16x128xbf16>
    %cst_13 = arith.constant dense<0.000000e+00> : vector<16x128xf32>
    %14 = tpu.matmul %13, %2, %cst_13 {dimension_numbers = #tpu.dot_dimension_numbers<[1], [0], [0], [1], [0, 0, 1, 1], [], []>} : vector<16x128xbf16>, vector<128x128xbf16>, vector<16x128xf32> -> vector<16x128xf32>
    %15 = arith.addf %14, %6 : vector<16x128xf32>
    %cst_14 = arith.constant 0.000000e+00 : f32
    %16 = vector.broadcast %cst_14 : f32 to vector<16x128xf32>
    %17 = arith.maximumf %15, %16 : vector<16x128xf32>
    %18 = arith.truncf %17 : vector<16x128xf32> to vector<16x128xbf16>
    %cst_15 = arith.constant dense<0.000000e+00> : vector<16x128xf32>
    %19 = tpu.matmul %18, %3, %cst_15 {dimension_numbers = #tpu.dot_dimension_numbers<[1], [0], [0], [1], [0, 0, 1, 1], [], []>} : vector<16x128xbf16>, vector<128x128xbf16>, vector<16x128xf32> -> vector<16x128xf32>
    %20 = arith.addf %11, %19 : vector<16x128xf32>
    %21 = arith.addf %20, %9 : vector<16x128xf32>
    %c0_16 = arith.constant 0 : index
    %c0_17 = arith.constant 0 : index
    %c0_18 = arith.constant 0 : index
    %22 = vector.load %arg7[%c0_16, %c0_17, %c0_18] : memref<1x16x128xf32, #tpu.memory_space<vmem>>, vector<1x16x128xf32>
    %23 = vector.shape_cast %22 : vector<1x16x128xf32> to vector<16x128xf32>
    %24 = vector.shape_cast %21 : vector<16x128xf32> to vector<1x16x128xf32>
    tpu.vector_store %arg7[%c0_16, %c0_17, %c0_18], %24 {strides = array<i32>} : memref<1x16x128xf32, #tpu.memory_space<vmem>>, vector<1x16x128xf32>,
    return
  }
  func.func @transform_0(%arg0: i32) -> (i32, i32, i32) {
    %c0_i32 = arith.constant 0 : i32
    %c0_i32_0 = arith.constant 0 : i32
    %c0_i32_1 = arith.constant 0 : i32
    return %arg0, %c0_i32, %c0_i32_0 : i32, i32, i32
  }
  func.func @transform_1(%arg0: i32) -> (i32, i32, i32) {
    %c0_i32 = arith.constant 0 : i32
    %c0_i32_0 = arith.constant 0 : i32
    %c0_i32_1 = arith.constant 0 : i32
    return %arg0, %c0_i32, %c0_i32_0 : i32, i32, i32
  }
  func.func @transform_2(%arg0: i32) -> (i32, i32) {
    %c0_i32 = arith.constant 0 : i32
    %c0_i32_0 = arith.constant 0 : i32
    %c0_i32_1 = arith.constant 0 : i32
    return %c0_i32, %c0_i32_0 : i32, i32
  }
  func.func @transform_3(%arg0: i32) -> (i32, i32) {
    %c0_i32 = arith.constant 0 : i32
    %c0_i32_0 = arith.constant 0 : i32
    %c0_i32_1 = arith.constant 0 : i32
    return %c0_i32, %c0_i32_0 : i32, i32
  }
  func.func @transform_4(%arg0: i32) -> (i32, i32) {
    %c0_i32 = arith.constant 0 : i32
    %c0_i32_0 = arith.constant 0 : i32
    %c0_i32_1 = arith.constant 0 : i32
    return %c0_i32, %c0_i32_0 : i32, i32
  }
  func.func @transform_5(%arg0: i32) -> (i32, i32) {
    %c0_i32 = arith.constant 0 : i32
    %c0_i32_0 = arith.constant 0 : i32
    %c0_i32_1 = arith.constant 0 : i32
    return %c0_i32, %c0_i32_0 : i32, i32
  }
  func.func @transform_6(%arg0: i32) -> (i32, i32, i32) {
    %c0_i32 = arith.constant 0 : i32
    %c0_i32_0 = arith.constant 0 : i32
    %c0_i32_1 = arith.constant 0 : i32
    return %arg0, %c0_i32, %c0_i32_0 : i32, i32, i32
  }
}

</mosaic_0001>

<bundles_post_ra>
// kernel: tpu_custom_call.1
= control target key start
LH: loop header
LB: loop body
LE: loop exit
PB: predicated region body
PF: predicated region fallthrough
CT: control target
= control target key end

     0   :  { %s1474_s0 = inlined_call_operand.hbm [shape: f32[2,16,128], index: 0, kind: input, shape index: {}, may-alias: {0,6}]   ;;  %s1475_s1 = inlined_call_operand.hbm [shape: f32[2,16,16], index: 1, kind: input, shape index: {}]   ;;  %s1476_s2 = inlined_call_operand.vmem [shape: bf16[128,128], index: 2, kind: input, shape index: {}]   ;;  %s1477_s3 = inlined_call_operand.vmem [shape: f32[1,128], index: 3, kind: input, shape index: {}]   ;;  %s1478_s4 = inlined_call_operand.hbm [shape: bf16[128,128], index: 4, kind: input, shape index: {}]   ;;  %s1479_s5 = inlined_call_operand.vmem [shape: f32[1,128], index: 5, kind: input, shape index: {}]   ;;  %s1480_s6 = inlined_call_operand.hbm [shape: f32[2,16,128], index: 6, kind: output, shape index: {}, may-alias: {0,6}]  }
   0x1   :  { %1484 = sst [smem:[#allocation14_spill]] %s1474_s0 }
   0x2   :  { %1485 = sst [smem:[#allocation15_spill]] %s1478_s4 }
   0x3   :  { %11 = vsyncpa [#allocation3], 0 }
   0x4   :  { %13 = vsyncpa [#allocation3 + $0x1], 0 }
   0x5   :  { %14 = vsyncpa [#allocation6], 0 }
   0x6   :  { %16 = vsyncpa [#allocation6 + $0x1], 0 }
   0x7   :  { %17 = vsyncpa [#allocation4], 0 }
   0x8   :  { %19 = vsyncpa [#allocation4 + $0x1], 0  ;;  %s1177_s21 = smov 0   ;;  %s1179_s22 = smov 0  }
   0x9   :  { %s1181_s23 = smov 0   ;;  %s1183_s24 = smov 0  }
   0xa LB: > { %s1198_s25 = sadd.s32 4294967295, %s1128_s24   ;;  %s764_s26 = sadd.s32 4294967294, %s1128_s24   ;;  %s1128_s24 = sphi %s1183_s24, %s1506_s24   ;;  %s1124_s23 = sphi %s1181_s23, %s1505_s23   ;;  %s1120_s22 = sphi %s1179_s22, %s1504_s22   ;;  %s1116_s21 = sphi %s1177_s21, %s1503_s21  }
   0xb   : > { %p45_p0 = scmp.ne.s32.totalorder %s1120_s22, %s1116_s21  ;;  %p1481_p1 = scmp.eq.s32.totalorder %s1198_s25, 0 }
   0xc   : > { %p185_p3 = scmp.eq.s32.totalorder %s764_s26, 1  ;;  %p765_p5 = scmp.ge.s32.totalorder %s1128_s24, 1 }
   0xd   : > { %p1207_p4 = por %p1481_p1, %p45_p0  ;;  %p192_p7 = scmp.lt.s32.totalorder %s1128_s24, 3 }
   0xe   : > { %p1212_p6 = por %p185_p3, %p45_p0  ;;  %s1130_s30 = smov [#allocation7]  }
   0xf   : > { %s1486_s27 = scalar_select %p1207_p4, 1, 0 }
  0x10   : > { %s1487_s28 = scalar_select %p1212_p6, 1, 0 }
  0x11   : > { %p1217_p8 = pnand %p765_p5, %p192_p7  ;;  %s210_s7 = sshll.u32 %s1130_s30, 4  ;;  %s1221_s7 = int_to_ptr.vmem [resolvable:$true] %s210_s7 }
  0x12   : > { %s1233_s9 = sadd.s32 1, %s1128_s24   ;;  %s32_s10 = sadd.s32 1, %s1124_s23 }
  0x13   : > { %s1488_s29 = scalar_select %p1217_p8, 1, 0 }
  0x14   : > { %p890_p9 = pneg %p1217_p8  ;;  %s29_s11 = ssub.s32 %s1128_s24, %s1233_s9 }
  0x15   : > { %s1490_s4 = sld [smem:[#allocation15_spill]] }
  0x16   : > { %p1228_p11 = pnand %p890_p9, %p1481_p1 }
  0x18   : > { %p968_p13 = pneg %p1228_p11 }
  0x1b   : > { %s966_s14 = scalar_lea.hbm %s1490_s4, 1024 }
  0x1c   : > { %p967_p12 = scmp.ne.s32.totalorder %s1490_s4, %s966_s14  ;;  %p973_p5 = scmp.lt.u32.totalorder %s966_s14, %s1490_s4 }
  0x1e   : > { %p969_p0 = pnand %p968_p13, %p967_p12 }
  0x20   : > { %p970_p3 = pneg %p969_p0 }
  0x22   : > { %p975_p7 = pnand %p973_p5, %p970_p3 }
  0x24   : > { %978 = shalt.err (!%p975_p7)
}
  0x25   : > { %s979_s19 = scalar_lea.vmem %s1221_s7, 1024  ;;  %p987_p2 = scmp.lt.s32.totalorder %s1221_s7, %s1221_s7 }
  0x26   : > { %p980_p9 = scmp.ne.s32.totalorder %s1221_s7, %s979_s19  ;;  %p988_p6 = scmp.lt.s32.totalorder %s979_s19, %s979_s19 }
  0x28   : > { %p982_p10 = pnand %p980_p9, %p968_p13  ;;  %p989_p4 = por %p988_p6, %p987_p2 }
  0x2a   : > { %p983_p1 = pneg %p982_p10 }
  0x2c   : > { %p990_p8 = pnand %p989_p4, %p983_p1 }
  0x2e   : > { %993 = shalt.err (!%p990_p8)
}
  0x2f   : > { %s1131_s20 = smov 64   ;;  %s1132_s26 = smov 4  }
  0x30   : > { %893 = dma.hbm_to_vmem [thread:$0]  (!%p1228_p11), %s1490_s4, 1024, %s1221_s7, [#allocation6], %s1131_s20, %s1131_s20, %s1132_s26  }
  0x31   : > { %p30_p1 = scmp.eq.s32.totalorder %s29_s11, 0  ;;  %p39_p2 = scmp.ne.s32.totalorder %s1124_s23, %s1120_s22 }
  0x32   : > { %p40_p4 = scmp.eq.s32.totalorder %s1128_s24, 0  ;;  %p906_p6 = scmp.lt.s32.totalorder %s1128_s24, 2 }
  0x33   : > { %s1264_s13 = scalar_select %p30_p1, %s1124_s23, %s32_s10  }
  0x34   : > { %p41_p8 = por %p40_p4, %p39_p2  ;;  %p1492_p10 = scmp.eq.s32.totalorder %s1198_s25, 1 }
  0x35   : > { %1491 = sst [smem:[#allocation13_spill]] %s1264_s13  ;;  %s227_s15 = sand.u32 1, %s1124_s23  }
  0x36   : > { %p1268_p12 = por %p1492_p10, %p39_p2  ;;  %s804_s16 = sshll.u32 %s1128_s24, 8 }
  0x37   : > { %s1274_s17 = sshll.u32 %s227_s15, 4  ;;  %s1494_s0 = sld [smem:[#allocation14_spill]] }
  0x38   : > { %s231_s10 = scalar_lea.vmem [#allocation2], %s1274_s17  ;;  %p1284_p11 = pnand %p906_p6, %p41_p8 }
  0x39   : > { %s238_s11 = sshll.u32 %s231_s10, 4  ;;  %s1290_s20 = scalar_lea.sflag [#allocation3], %s227_s15  ;;  %s1288_s11 = int_to_ptr.vmem [resolvable:$true] %s238_s11 }
  0x3a   : > { %p996_p0 = pneg %p1284_p11 }
  0x3d   : > { %s1281_s7 = scalar_lea.hbm %s1494_s0, %s804_s16  ;;  %s999_s8 = scalar_lea.hbm %s1494_s0, 512 }
  0x3e   : > { %s994_s26 = scalar_lea.hbm %s1281_s7, 256  ;;  %p1000_p7 = scmp.lt.u32.totalorder %s1281_s7, %s1494_s0 }
  0x3f   : > { %p995_p13 = scmp.ne.s32.totalorder %s1281_s7, %s994_s26  ;;  %p1001_p9 = scmp.lt.u32.totalorder %s999_s8, %s994_s26 }
  0x40   : > { %p1003_p2 = scmp.lt.u32.totalorder %s994_s26, %s1281_s7 }
  0x41   : > { %p997_p3 = pnand %p996_p0, %p995_p13  ;;  %p1002_p1 = por %p1001_p9, %p1000_p7 }
  0x43   : > { %p998_p5 = pneg %p997_p3  ;;  %p1004_p4 = por %p1003_p2, %p1002_p1 }
  0x45   : > { %p1005_p6 = pnand %p1004_p4, %p998_p5 }
  0x47   : > { %1008 = shalt.err (!%p1005_p6)
}
  0x48   : > { %s1009_s15 = scalar_lea.vmem %s1288_s11, 256  ;;  %s1133_s30 = smov [#allocation2]  }
  0x49   : > { %p1010_p8 = scmp.ne.s32.totalorder %s1288_s11, %s1009_s15  ;;  %s1014_s12 = sshll.u32 %s1133_s30, 4  ;;  %s1015_s12 = int_to_ptr.vmem [resolvable:$false] %s1014_s12 }
  0x4a   : > { %s1016_s18 = scalar_lea.vmem %s1015_s12, 512  ;;  %p1017_p3 = scmp.lt.s32.totalorder %s1288_s11, %s1015_s12 }
  0x4b   : > { %p1012_p10 = pnand %p1010_p8, %p996_p0  ;;  %p1018_p7 = scmp.lt.s32.totalorder %s1016_s18, %s1009_s15 }
  0x4d   : > { %p1013_p13 = pneg %p1012_p10  ;;  %p1019_p9 = por %p1018_p7, %p1017_p3 }
  0x4f   : > { %p1020_p1 = pnand %p1019_p9, %p1013_p13 }
  0x51   : > { %1023 = shalt.err (!%p1020_p1)
}
  0x52   : > { %s1134_s26 = smov 128   ;;  %s1135_s8 = smov 8  }
  0x53   : > { %897 = dma.hbm_to_vmem [thread:$0]  (!%p1284_p11), %s1281_s7, 256, %s1288_s11, %s1290_s20, %s1134_s26, %s1134_s26, %s1135_s8  }
  0x54   : > { %s1326_s30 = scalar_lea.hbm %s1475_s1, %s804_s16  ;;  %s252_s12 = scalar_lea.vmem [#allocation5], %s1274_s17 }
  0x55   : > { %s259_s18 = sshll.u32 %s252_s12, 4  ;;  %s248_s0 = sand.u32 1, %s1128_s24   ;;  %s1330_s18 = int_to_ptr.vmem [resolvable:$true] %s259_s18 }
  0x56   : > { %s1332_s4 = scalar_lea.sflag [#allocation6], %s248_s0  ;;  %s1024_s13 = scalar_lea.hbm %s1326_s30, 256 }
  0x57   : > { %p1025_p5 = scmp.ne.s32.totalorder %s1326_s30, %s1024_s13  ;;  %s1029_s11 = scalar_lea.hbm %s1475_s1, 512 }
  0x58   : > { %p1030_p6 = scmp.lt.u32.totalorder %s1326_s30, %s1475_s1  ;;  %p1031_p8 = scmp.lt.u32.totalorder %s1029_s11, %s1024_s13 }
  0x59   : > { %p1027_p2 = pnand %p1025_p5, %p996_p0  ;;  %p1033_p13 = scmp.lt.u32.totalorder %s1024_s13, %s1326_s30 }
  0x5a   : > { %p1032_p10 = por %p1031_p8, %p1030_p6 }
  0x5b   : > { %p1028_p4 = pneg %p1027_p2 }
  0x5c   : > { %p1034_p3 = por %p1033_p13, %p1032_p10 }
  0x5e   : > { %p1035_p7 = pnand %p1034_p3, %p1028_p4 }
  0x60   : > { %1038 = shalt.err (!%p1035_p7)
}
  0x61   : > { %s1039_s0 = scalar_lea.vmem %s1330_s18, 256  ;;  %s1136_s17 = smov [#allocation5]  }
  0x62   : > { %p1040_p9 = scmp.ne.s32.totalorder %s1330_s18, %s1039_s0  ;;  %s1044_s15 = sshll.u32 %s1136_s17, 4  ;;  %s1045_s15 = int_to_ptr.vmem [resolvable:$false] %s1044_s15 }
  0x63   : > { %s1046_s12 = scalar_lea.vmem %s1045_s15, 512  ;;  %p1047_p2 = scmp.lt.s32.totalorder %s1330_s18, %s1045_s15 }
  0x64   : > { %p1042_p1 = pnand %p1040_p9, %p996_p0  ;;  %p1048_p6 = scmp.lt.s32.totalorder %s1046_s12, %s1039_s0 }
  0x66   : > { %p1043_p5 = pneg %p1042_p1  ;;  %p1049_p8 = por %p1048_p6, %p1047_p2 }
  0x68   : > { %p1050_p10 = pnand %p1049_p8, %p1043_p5 }
  0x6a   : > { %1053 = shalt.err (!%p1050_p10)
}
  0x6b   : > { %900 = dma.hbm_to_vmem [thread:$0]  (!%p1284_p11), %s1326_s30, 256, %s1330_s18, %s1332_s4, %s1134_s26, %s1134_s26, %s1135_s8  }
  0x6c   : > { %p1496_p0 = scmp.ne.s32.totalorder %s1488_s29, 0 }
  0x6d   : > { %s1364_s13 = sand.u32 (!%p1496_p0), 1, %s1120_s22   ;;  %p1497_p4 = scmp.ne.s32.totalorder (!%p1496_p0), %s1486_s27, 0 }
  0x6e   : > { %271 = sbr.rel (%p1496_p0) target bundleno = 799 (0x31f), region = 44  ;;  %s1367_s7 = sshll.u32 (!%p1496_p0), %s1364_s13, 4 }
  0x6f   : > { %s274_s19 = scalar_lea.sflag (!%p1496_p0), [#allocation3], %s1364_s13  ;;  %s277_s16 = scalar_lea.vmem (!%p1496_p0), [#allocation2], %s1367_s7 }
  0x75   : > { %1099 = dma.done.wait (%p1497_p4), %s274_s19, 256  }
  0x76   : > { %1101 = vsyncadd (%p1497_p4), %s274_s19, 4294967040  ;;  %s282_s4 = sand.u32 1, %s1198_s25   ;;  %s286_s26 = scalar_lea.vmem [#allocation5], %s1367_s7 }
  0x77   : > { %s283_s29 = scalar_lea.sflag [#allocation6], %s282_s4 }
  0x78   : > { %1103 = dma.done.wait (%p1497_p4), %s283_s29, 256  }
  0x79   : > { %1105 = vsyncadd (%p1497_p4), %s283_s29, 4294967040  ;;  %p1498_p11 = scmp.eq.s32.totalorder %s1198_s25, 0 }
  0x7b   : > { %1107 = dma.done.wait (%p1498_p11), [#allocation6], 1024   ;;  %p1499_p13 = pmov %p1498_p11 }
  0x7c   : > { %v1137_v0 = vmov 0.0   ;;  %vm375_vm0 = vcmask 130048   ;;  %v1385_v1 = vld [vmem:[%s277_s16] sm:$0xff]  ;;  %v1387_v2 = vld [vmem:[%s277_s16 + $0x8] sm:$0xff]  ;;  %vm1138_vm1 = vmmov 0   ;;  %s323_s11 = scalar_lea.vmem [#allocation8], %s1367_s7 }
  0x7d   : > { %1109 = vsyncadd (%p1499_p13), [#allocation6], 4294966272  ;;  %836 = vmatprep.subr.bf16.mxu1 %v1137_v0  ;;  %v325_v3 = vld [vmem:[%s286_s26] sm:$0xff]  ;;  %v876_v4 = vpack.c.bf16 %v1387_v2, %v1385_v1  ;;  %v326_v6 = vld [vmem:[%s286_s26 + $0x8] sm:$0xff]  ;;  %852 = vmatprep.mubr.msk.bf16.mxu1 %vm1138_vm1, %v1137_v0  ;;  %s659_s20 = sshll.u32 %s323_s11, 4  ;;  %s806_s10 = sshll.u32 %s1198_s25, 8  ;;  %s1424_s20 = int_to_ptr.vmem [resolvable:$true] %s659_s20 }
  0x7e   : > { %833 = vmatprep.mubr.msk.f32.mxu0 %vm375_vm0, %v325_v3  ;;  %v950_v5 = vld [vmem:[%s1476_s2] sm:$0xff]   ;;  %v951_v7 = vld [vmem:[%s1476_s2 + $0x8] sm:$0xff]   ;;  %v952_v8 = vld [vmem:[%s1476_s2 + $0x10] sm:$0xff]   ;;  %s1430_s7 = scalar_lea.hbm %s1480_s6, %s806_s10  ;;  %s646_s15 = scalar_lea.sflag [#allocation4], %s1364_s13 }
  0x7f   : > { %877 = vmatprep.subr.bf16.mxu0 %v876_v4  ;;  %837 = vmatpush3.bf16.msra.mxu1 %v950_v5  ;;  %v953_v9 = vld [vmem:[%s1476_s2 + $0x18] sm:$0xff]   ;;  %v954_v10 = vld [vmem:[%s1476_s2 + $0x20] sm:$0xff]   ;;  %v955_v11 = vld [vmem:[%s1476_s2 + $0x28] sm:$0xff]   ;;  %s1054_s25 = scalar_lea.vmem %s1424_s20, 256  ;;  %s1139_s12 = smov [#allocation8]  }
  0x80   : > { %879 = vmatpush3.bf16.msra.mxu0 %v876_v4  ;;  %838 = vmatprep.subr.bf16.mxu1 %v1137_v0  ;;  %v956_v12 = vld [vmem:[%s1476_s2 + $0x30] sm:$0xff]   ;;  %v957_v13 = vld [vmem:[%s1476_s2 + $0x38] sm:$0xff]   ;;  %v958_v14 = vld [vmem:[#allocation7] sm:$0xff]   ;;  %p1055_p3 = scmp.ne.s32.totalorder %s1424_s20, %s1054_s25  ;;  %s1058_s19 = sshll.u32 %s1139_s12, 4  ;;  %s1059_s19 = int_to_ptr.vmem [resolvable:$false] %s1058_s19 }
  0x81   : > { %856 = vmatprep.subr.bf16.mxu0 %v1137_v0  ;;  %v959_v15 = vld [vmem:[#allocation7 + $0x8] sm:$0xff]   ;;  %v960_v16 = vld [vmem:[#allocation7 + $0x10] sm:$0xff]   ;;  %v961_v17 = vld [vmem:[#allocation7 + $0x18] sm:$0xff]   ;;  %s1060_s16 = scalar_lea.vmem %s1059_s19, 512  ;;  %p1061_p1 = scmp.lt.s32.totalorder %s1424_s20, %s1059_s19 }
  0x82   : > { %v962_v18 = vld [vmem:[#allocation7 + $0x20] sm:$0xff]   ;;  %v963_v19 = vld [vmem:[#allocation7 + $0x28] sm:$0xff]   ;;  %v964_v23 = vld [vmem:[#allocation7 + $0x30] sm:$0xff]   ;;  %p1056_p7 = pnand %p1055_p3, %p1268_p12  ;;  %p1062_p5 = scmp.lt.s32.totalorder %s1060_s16, %s1054_s25 }
  0x83   : > { %834 = vmatmul.mubr.msk.f32.vlgmr.msra.gmra.mrb[0].mxu0 %vm375_vm0, %v326_v6  ;;  %839 = vmatpush3.bf16.msra.mxu1 %v951_v7  ;;  %v965_v24 = vld [vmem:[#allocation7 + $0x38] sm:$0xff]   ;;  %v779_v25 = vld [vmem:[%s1477_s3] ss:$0 sm:$0xff] }
  0x84   : > { %840 = vmatprep.subr.bf16.mxu1 %v1137_v0  ;;  %872 = vmatprep.mubr.msk.bf16.mxu0 %vm1138_vm1, %v1137_v0  ;;  %v780_v35 = vld [vmem:[%s1479_s5] ss:$0 sm:$0xff]  ;;  %p1057_p9 = pneg %p1056_p7  ;;  %p1063_p2 = por %p1062_p5, %p1061_p1 }
  0x85   : > { %857 = vmatpush3.bf16.msra.mxu0 %v958_v14 }
  0x86   : > { %858 = vmatprep.subr.bf16.mxu0 %v1137_v0  ;;  %p1064_p6 = pnand %p1063_p2, %p1057_p9 }
  0x87   : > { %841 = vmatpush3.bf16.msra.mxu1 %v952_v8 }
  0x88   : > { %842 = vmatprep.subr.bf16.mxu1 %v1137_v0 }
  0x89   : > { %859 = vmatpush3.bf16.msra.mxu0 %v959_v15 }
  0x8a   : > { %860 = vmatprep.subr.bf16.mxu0 %v1137_v0 }
  0x8b   : > { %843 = vmatpush3.bf16.msra.mxu1 %v953_v9 }
  0x8c   : > { %844 = vmatprep.subr.bf16.mxu1 %v1137_v0 }
  0x8d   : > { %861 = vmatpush3.bf16.msra.mxu0 %v960_v16 }
  0x8e   : > { %862 = vmatprep.subr.bf16.mxu0 %v1137_v0 }
  0x8f   : > { %845 = vmatpush3.bf16.msra.mxu1 %v954_v10 }
  0x90   : > { %846 = vmatprep.subr.bf16.mxu1 %v1137_v0 }
  0x91   : > { %863 = vmatpush3.bf16.msra.mxu0 %v961_v17 }
  0x92   : > { %864 = vmatprep.subr.bf16.mxu0 %v1137_v0 }
  0x93   : > { %847 = vmatpush3.bf16.msra.mxu1 %v955_v11 }
  0x94   : > { %848 = vmatprep.subr.bf16.mxu1 %v1137_v0 }
  0x95   : > { %865 = vmatpush3.bf16.msra.mxu0 %v962_v18 }
  0x96   : > { %866 = vmatprep.subr.bf16.mxu0 %v1137_v0 }
  0x97   : > { %849 = vmatpush3.bf16.msra.mxu1 %v956_v12 }
  0x98   : > { %850 = vmatprep.subr.bf16.mxu1 %v1137_v0 }
  0x99   : > { %867 = vmatpush3.bf16.msra.mxu0 %v963_v19 }
  0x9a   : > { %868 = vmatprep.subr.bf16.mxu0 %v1137_v0 }
  0x9b   : > { %851 = vmatpush3.bf16.msra.mxu1 %v957_v13 }
  0x9d   : > { %869 = vmatpush3.bf16.msra.mxu0 %v964_v23 }
  0x9e   : > { %870 = vmatprep.subr.bf16.mxu0 %v1137_v0 }
  0xa1   : > { %871 = vmatpush3.bf16.msra.mxu0 %v965_v24 }
 0x156   : > { %v835_v20 = vpop.f32.mrb[0].mxu0 }
 0x157   : > { %v448_v21 = vpop.f32.mrb[1].mxu0 }
 0x158   : > { %v457_v22 = vpack.c.bf16 %v835_v20, %v448_v21 }
 0x15a   : > { %853 = vmatmul.mubr.bf16.vlgmr.msra.gmra.mrb[0].mxu1 %v457_v22 }
 0x22d   : > { %v540_v26 = vpop.f32.mrb[0].mxu1 }
 0x22e   : > { %v541_v27 = vadd.f32 %v779_v25, %v540_v26  ;;  %v854_v28 = vpop.f32.mrb[1].mxu1 }
 0x22f   : > { %v543_v29 = vpop.f32.mrb[2].mxu1 }
 0x230   : > { %v544_v30 = vadd.f32 %v779_v25, %v543_v29  ;;  %v855_v31 = vpop.f32.mrb[3].mxu1  ;;  %v547_v32 = vmax.f32 %v541_v27, 0.0 }
 0x232   : > { %v548_v33 = vmax.f32 %v544_v30, 0.0 }
 0x234   : > { %v549_v34 = vpack.c.bf16 %v548_v33, %v547_v32 }
 0x236   : > { %873 = vmatmul.mubr.bf16.vlgmr.msra.gmra.mrb[4].mxu0 %v549_v34 }
 0x309   : > { %v632_v36 = vpop.f32.mrb[4].mxu0 }
 0x30a   : > { %v639_v37 = vadd.f32 %v632_v36, %v1385_v1  ;;  %v874_v38 = vpop.f32.mrb[5].mxu0 }
 0x30b   : > { %v635_v39 = vpop.f32.mrb[6].mxu0 }
 0x30c   : > { %v641_v40 = vadd.f32 %v780_v35, %v639_v37  ;;  %v640_v41 = vadd.f32 %v635_v39, %v1387_v2  ;;  %v875_v42 = vpop.f32.mrb[7].mxu0 }
 0x30e   : > { %643 = vst [vmem:[%s323_s11] sm:$0xff] %v641_v40  ;;  %v642_v43 = vadd.f32 %v780_v35, %v640_v41 }
 0x310   : > { %644 = vst [vmem:[%s323_s11 + $0x8] sm:$0xff] %v642_v43 }
 0x311   : > { %1067 = shalt.err (!%p1064_p6)
}
 0x312   : > { %s1068_s4 = scalar_lea.hbm %s1430_s7, 256  ;;  %s1072_s27 = scalar_lea.hbm %s1480_s6, 512 }
 0x313   : > { %p1069_p8 = scmp.ne.s32.totalorder %s1430_s7, %s1068_s4  ;;  %p1073_p4 = scmp.lt.u32.totalorder %s1430_s7, %s1480_s6 }
 0x314   : > { %p1074_p11 = scmp.lt.u32.totalorder %s1072_s27, %s1068_s4  ;;  %p1076_p3 = scmp.lt.u32.totalorder %s1068_s4, %s1430_s7 }
 0x315   : > { %p1070_p10 = pnand %p1069_p8, %p1268_p12 }
 0x316   : > { %p1075_p13 = por %p1074_p11, %p1073_p4 }
 0x317   : > { %p1071_p0 = pneg %p1070_p10 }
 0x318   : > { %p1077_p7 = por %p1076_p3, %p1075_p13 }
 0x31a   : > { %p1078_p9 = pnand %p1077_p7, %p1071_p0 }
 0x31c   : > { %1081 = shalt.err (!%p1078_p9)
}
 0x31d   : > { %s1140_s18 = smov 128   ;;  %s1141_s11 = smov 8  }
 0x31e   : > { %888 = dma.vmem_to_hbm [thread:$0]  (%p1268_p12), %s1424_s20, 256, %s1430_s7, %s646_s15, %s1140_s18, %s1140_s18, %s1141_s11  }
 0x31f PF: > { %s674_s10 = sand.u32 1, %s1116_s21   ;;  %p1500_p1 = scmp.ne.s32.totalorder %s1487_s28, 0 }
 0x320   : > { %p1501_p5 = scmp.ge.s32.totalorder %s1128_s24, 2  ;;  %s675_s0 = scalar_lea.sflag [#allocation4], %s674_s10 }
 0x322   : > { %p902_p2 = pnand %p1501_p5, %p1500_p1 }
 0x324   : > { %1111 = dma.done.wait (!%p902_p2), %s675_s0, 256  }
 0x325   : > { %1113 = vsyncadd (!%p902_p2), %s675_s0, 4294967040  ;;  %s1502_s17 = sld [smem:[#allocation13_spill]]  ;;  %p22_p6 = scmp.ge.s32.totalorder %s1233_s9, 4  }
 0x326   : > { %s1503_s21 = smov %s1120_s22  ;;  %s1504_s22 = smov %s1124_s23 }
 0x327   : > { %s1506_s24 = smov %s1233_s9  ;;  %24 = sbr.rel (!%p22_p6) target bundleno = 10 (0xa), region = 106 }
 0x32b   : > { %s1505_s23 = smov %s1502_s17 }
 0x32e   :  { %680 = vsyncpa [#allocation3], 1 }
 0x32f   :  { %682 = vsyncpa [#allocation3 + $0x1], 1 }
 0x330   :  { %683 = vsyncpa [#allocation6], 1 }
 0x331   :  { %685 = vsyncpa [#allocation6 + $0x1], 1 }
 0x332   :  { %686 = vsyncpa [#allocation4], 1 }
 0x333   :  { %688 = vsyncpa [#allocation4 + $0x1], 1 }

</bundles_post_ra>
